<compile_context>
chip_gen: v7x
topology: tpu7x:2x2x1
jax: 0.10.0
libtpu: 0.0.40
codegen_flags: <defaults>
</compile_context>

<pallas_src>
import functools

import jax
import jax.numpy as jnp
from jax.experimental import pallas as pl
from jax.experimental.pallas import tpu as pltpu

EPS = 1e-6


# --------------------------------------------------------------------------
# VMEM budgets (per TPU generation) and tile sizing
# --------------------------------------------------------------------------
def _vmem_limits():
    """(vmem_limit_bytes, tile_budget_bytes) derived from the chip's VMEM."""
    cap = 64 * 1024 * 1024  # conservative default (v7x per-TC VMEM)
    try:
        info = pltpu.get_tpu_info()
        cap = int(getattr(info, "vmem_capacity_bytes", cap) or cap)
    except Exception:  # query unavailable: keep the conservative default
        pass
    limit = min(int(cap * 0.75), 100 * 1024 * 1024)
    budget = min(int(cap * 0.60), 80 * 1024 * 1024)
    return limit, budget


def _pick_tile_n(N, bytes_per_row, fixed_bytes, budget, min_grid_steps=2):
    """Largest row tile (multiple of 8, dividing N) that fits the budget.

    Prefers tiles giving >= min_grid_steps grid steps (so v7x's two
    TensorCores can both be used via the 'parallel' row axis).  Never returns
    a block bigger than the smallest aligned divisor when the budget is tight.
    """
    cands = (1024, 512, 256, 128, 64, 32, 16, 8)
    divisors = [c for c in cands if N % c == 0]
    for c in divisors:  # pass 1: fits budget AND leaves >=2 grid steps
        if c * min_grid_steps <= N and fixed_bytes + c * bytes_per_row <= budget:
            return c
    for c in divisors:  # pass 2: fits budget (single grid step OK)
        if fixed_bytes + c * bytes_per_row <= budget:
            return c
    if divisors:        # pass 3: smallest aligned divisor (budget floor)
        return divisors[-1]
    return N            # tiny / unaligned N: one full-extent block


def _pick_tile_do(D, w_itemsize, budget):
    """Output-column tile for the Linear; full D when the weight fits VMEM."""
    w_budget = budget // 3  # keep >= 2/3 of the budget for row tiles
    if D * D * w_itemsize <= w_budget or D % 128 != 0:
        return D
    cand = D
    while (cand % 2 == 0 and (cand // 2) % 128 == 0
           and 2 * D * cand * w_itemsize > w_budget):  # x2: double-buffered W
        cand //= 2
    return cand


def _lane_dense_shape(N, D):
    """Re-pack an (N, D) elementwise problem to a 128-multiple last dim."""
    total = N * D
    if D % 128 == 0:
        return N, D
    for cols in (4096, 2048, 1024, 512, 256, 128):
        if total % cols == 0:
            return total // cols, cols
    return N, D


# --------------------------------------------------------------------------
# Kernels
# --------------------------------------------------------------------------
def _layernorm_rows(x_f32, g_ref, b_ref, approx_recip):
    """LN matching the PyTorch ref: unbiased std (D-1), eps added to std."""
    d = x_f32.shape[-1]
    mean = jnp.mean(x_f32, axis=-1, keepdims=True)
    centered = x_f32 - mean
    var = jnp.sum(centered * centered, axis=-1, keepdims=True) / (d - 1)
    std = jnp.sqrt(var)
    # approx=False -> exact divide (needed for 1e-4 validation);
    # approx=True  -> EUP vrcp (free slot) when the caller's tolerance allows.
    inv = pl.reciprocal(std + EPS, approx=approx_recip)
    return (g_ref[...].astype(jnp.float32) * (centered * inv)
            + b_ref[...].astype(jnp.float32))


def fused_ln_linear_residual_kernel(x_ref, g_ref, b_ref, w_ref, bias_ref,
                                    o_ref, normed_ref, *, approx_recip):
    """o[:, j-block] = x[:, j-block] + (LayerNorm(x) @ W[:, j-block] + bias)."""
    j = pl.program_id(1)

    # LayerNorm once per row tile (first column step), staged in the weight
    # dtype so bf16 weights give bf16 MXU operands.
    @pl.when(j == 0)
    def _():
        x = x_ref[...].astype(jnp.float32)
        normed_ref[...] = _layernorm_rows(
            x, g_ref, b_ref, approx_recip).astype(normed_ref.dtype)

    y = jnp.dot(normed_ref[...], w_ref[...],
                preferred_element_type=jnp.float32)           # MXU, f32 acc
    y = y + bias_ref[...].astype(jnp.float32)

    tile_do = o_ref.shape[-1]
    if tile_do == x_ref.shape[-1]:                            # no column tiling
        x_res = x_ref[...].astype(jnp.float32)
    else:
        col = pl.multiple_of(j * tile_do, tile_do)
        x_res = x_ref[:, pl.ds(col, tile_do)].astype(jnp.float32)

    # nn.Dropout in eval mode: identity.
    o_ref[...] = (x_res + y).astype(o_ref.dtype)


def layernorm_kernel(x_ref, g_ref, b_ref, o_ref, *, approx_recip):
    x = x_ref[...].astype(jnp.float32)
    o_ref[...] = _layernorm_rows(x, g_ref, b_ref, approx_recip).astype(o_ref.dtype)


def residual_add_kernel(x_ref, y_ref, o_ref):
    """o = x + dropout(y), dropout in eval mode (identity)."""
    o_ref[...] = x_ref[...] + y_ref[...]


# --------------------------------------------------------------------------
# Wrappers
# --------------------------------------------------------------------------
def sublayer_connection_fused_linear(x, w, bias, gamma, beta,
                                     approx_recip=False):
    """Fused path: sublayer is Linear(D -> D).  x: [B, S, D].

    Pass bf16 x / w / bias for HBM-bandwidth and MXU-throughput wins; the
    kernel keeps f32 internal math and f32 matmul accumulation.
    """
    B, S, D = x.shape
    N = B * S
    x2d = x.reshape(N, D)
    limit, budget = _vmem_limits()

    x_i = jnp.dtype(x.dtype).itemsize
    w_i = jnp.dtype(w.dtype).itemsize

    tile_do = _pick_tile_do(D, w_i, budget)
    n_col = D // tile_do

    # Per-row VMEM: x tile (2x buffered) + out tile (2x) + normed scratch
    # + ~4 f32 temporaries for the LN math (always counted at 4 B/elem).
    bytes_per_row = 2 * D * x_i + 2 * tile_do * x_i + D * w_i + 4 * D * 4
    w_bufs = 1 if n_col == 1 else 2
    fixed = w_bufs * D * tile_do * w_i + 8 * D * 4
    tile_n = _pick_tile_n(N, bytes_per_row, fixed, budget)

    const_mode = pl.Buffered(1)                      # gamma/beta never change
    w_mode = pl.Buffered(1) if n_col == 1 else pl.Buffered(2)

    kernel = functools.partial(fused_ln_linear_residual_kernel,
                               approx_recip=approx_recip)
    out2d = pl.pallas_call(
        kernel,
        out_shape=jax.ShapeDtypeStruct((N, D), x.dtype),
        grid_spec=pltpu.PrefetchScalarGridSpec(
            num_scalar_prefetch=0,
            grid=(N // tile_n, n_col),
            in_specs=[
                pl.BlockSpec((tile_n, D), lambda i, j: (i, 0)),        # x rows
                pl.BlockSpec((1, D), lambda i, j: (0, 0),
                             pipeline_mode=const_mode),                # gamma
                pl.BlockSpec((1, D), lambda i, j: (0, 0),
                             pipeline_mode=const_mode),                # beta
                pl.BlockSpec((D, tile_do), lambda i, j: (0, j),
                             pipeline_mode=w_mode),                    # W cols
                pl.BlockSpec((1, tile_do), lambda i, j: (0, j),
                             pipeline_mode=w_mode),                    # bias
            ],
            out_specs=pl.BlockSpec((tile_n, tile_do), lambda i, j: (i, j)),
            scratch_shapes=[pltpu.VMEM((tile_n, D), w.dtype)],         # normed
        ),
        compiler_params=pltpu.CompilerParams(
            dimension_semantics=("parallel", "arbitrary"),
            vmem_limit_bytes=limit),
    )(x2d, gamma.reshape(1, D), beta.reshape(1, D), w, bias.reshape(1, D))
    return out2d.reshape(B, S, D)


def layernorm_pallas(x2d, gamma, beta, approx_recip=False):
    N, D = x2d.shape
    limit, budget = _vmem_limits()
    x_i = jnp.dtype(x2d.dtype).itemsize
    bytes_per_row = 2 * D * x_i + 2 * D * x_i + 4 * D * 4
    tile_n = _pick_tile_n(N, bytes_per_row, 0, budget)
    kernel = functools.partial(layernorm_kernel, approx_recip=approx_recip)
    return pl.pallas_call(
        kernel,
        out_shape=jax.ShapeDtypeStruct((N, D), x2d.dtype),
        grid_spec=pltpu.PrefetchScalarGridSpec(
            num_scalar_prefetch=0,
            grid=(N // tile_n,),
            in_specs=[
                pl.BlockSpec((tile_n, D), lambda i: (i, 0)),
                pl.BlockSpec((1, D), lambda i: (0, 0),
                             pipeline_mode=pl.Buffered(1)),
                pl.BlockSpec((1, D), lambda i: (0, 0),
                             pipeline_mode=pl.Buffered(1)),
            ],
            out_specs=pl.BlockSpec((tile_n, D), lambda i: (i, 0)),
        ),
        compiler_params=pltpu.CompilerParams(
            dimension_semantics=("parallel",), vmem_limit_bytes=limit),
    )(x2d, gamma.reshape(1, D), beta.reshape(1, D))


def residual_add_pallas(x2d, y2d):
    N, D = x2d.shape
    # Lane-dense repack: elementwise add has no row structure, so present a
    # last dim that is a multiple of 128 (unmasked stores) whenever possible.
    rows, cols = _lane_dense_shape(N, D)
    xr, yr = x2d.reshape(rows, cols), y2d.reshape(rows, cols)
    limit, budget = _vmem_limits()
    itemsize = jnp.dtype(x2d.dtype).itemsize
    bytes_per_row = 2 * 3 * cols * itemsize  # 2 in + 1 out, double-buffered
    tile_r = _pick_tile_n(rows, bytes_per_row, 0, budget)
    out = pl.pallas_call(
        residual_add_kernel,
        out_shape=jax.ShapeDtypeStruct((rows, cols), x2d.dtype),
        grid_spec=pltpu.PrefetchScalarGridSpec(
            num_scalar_prefetch=0,
            grid=(rows // tile_r,),
            in_specs=[
                pl.BlockSpec((tile_r, cols), lambda i: (i, 0)),
                pl.BlockSpec((tile_r, cols), lambda i: (i, 0)),
            ],
            out_specs=pl.BlockSpec((tile_r, cols), lambda i: (i, 0)),
        ),
        compiler_params=pltpu.CompilerParams(
            dimension_semantics=("parallel",), vmem_limit_bytes=limit),
    )(xr, yr)
    return out.reshape(N, D)


def sublayer_connection(x, sublayer, gamma, beta, approx_recip=False):
    """Generic path: x: [B, S, D]; sublayer: arbitrary [B,S,D]->[B,S,D] fn."""
    B, S, D = x.shape
    x2d = x.reshape(B * S, D)
    normed = layernorm_pallas(x2d, gamma, beta, approx_recip)
    sub_out = sublayer(normed.reshape(B, S, D)).reshape(B * S, D)
    out2d = residual_add_pallas(x2d, sub_out)
    return out2d.reshape(B, S, D)


# Pure-JAX reference (mirrors the PyTorch forward).
def sublayer_connection_ref(x, sublayer, gamma, beta):
    mean = jnp.mean(x, axis=-1, keepdims=True)
    std = jnp.std(x, axis=-1, keepdims=True, ddof=1)  # unbiased, like torch
    normed = gamma * (x - mean) / (std + EPS) + beta
    return x + sublayer(normed)


# --------------------------------------------------------------------------
# Main
# --------------------------------------------------------------------------
if __name__ == "__main__":
    B, S, D = 2, 8, 32
    key = jax.random.PRNGKey(0)
    kx, kw = jax.random.split(key)

    x = jax.random.normal(kx, (B, S, D), dtype=jnp.float32)

    # LayerNorm parameters, initialized exactly as in __init__ (ones / zeros).
    gamma = jnp.ones((D,), dtype=jnp.float32)
    beta = jnp.zeros((D,), dtype=jnp.float32)

    # Deterministic example sublayer: a simple linear map D -> D.
    w_sub = jax.random.normal(kw, (D, D), dtype=jnp.float32) * 0.05
    b_sub = jnp.zeros((D,), dtype=jnp.float32)
    sublayer = lambda h: jnp.einsum("bsd,de->bse", h, w_sub) + b_sub

    ref = sublayer_connection_ref(x, sublayer, gamma, beta)

    # 1) Fused path, f32 weights (tight-tolerance validation).
    out_f32 = jax.block_until_ready(
        sublayer_connection_fused_linear(x, w_sub, b_sub, gamma, beta))
    assert out_f32.shape == (B, S, D)
    assert jnp.allclose(out_f32, ref, atol=1e-4, rtol=1e-4), \
        "fused kernel (f32) mismatch vs reference"

    # 2) Fused path, bf16 I/O + bf16 MXU operands (HBM/MXU-optimized mode).
    x_bf16 = x.astype(jnp.bfloat16)
    ref_bf16 = sublayer_connection_ref(
        x_bf16.astype(jnp.float32), sublayer, gamma, beta)
    out_bf16 = jax.block_until_ready(
        sublayer_connection_fused_linear(
            x_bf16, w_sub.astype(jnp.bfloat16), b_sub.astype(jnp.bfloat16),
            gamma, beta))
    assert out_bf16.dtype == jnp.bfloat16
    assert jnp.allclose(out_bf16.astype(jnp.float32), ref_bf16,
                        atol=6e-2, rtol=6e-2), \
        "fused kernel (bf16) mismatch vs reference"

    # 3) Generic path (arbitrary sublayer callable), f32.
    out_generic = jax.block_until_ready(
        sublayer_connection(x, sublayer, gamma, beta))
    assert out_generic.shape == (B, S, D)
    assert jnp.allclose(out_generic, ref, atol=1e-4, rtol=1e-4), \
        "generic path mismatch vs reference"

    print("KERNEL_OK")
</pallas_src>

<mosaic_0001>
module attributes {stable_mosaic.version = 11 : i64} {
  func.func @fused_ln_linear_residual_kernel(%arg0: i32, %arg1: i32, %arg2: memref<8x32xf32, #tpu.memory_space<vmem>>, %arg3: memref<1x32xf32, #tpu.memory_space<vmem>>, %arg4: memref<1x32xf32, #tpu.memory_space<vmem>>, %arg5: memref<32x32xf32, #tpu.memory_space<vmem>>, %arg6: memref<1x32xf32, #tpu.memory_space<vmem>>, %arg7: memref<8x32xf32, #tpu.memory_space<vmem>>, %arg8: memref<8x32xf32, #tpu.memory_space<vmem>>) attributes {dimension_semantics = [#tpu.dimension_semantics<parallel>, #tpu.dimension_semantics<arbitrary>], iteration_bounds = array<i64: 2, 1>, scalar_prefetch = 0 : i64, scratch_operands = 1 : i64, tpu.core_type = #tpu.core_type<tc>, window_params = [{transform_indices = @transform_0, window_bounds = array<i64: 8, 32>}, {pipeline_mode = #tpu.pipeline_mode<synchronous>, transform_indices = @transform_1, window_bounds = array<i64: 1, 32>}, {pipeline_mode = #tpu.pipeline_mode<synchronous>, transform_indices = @transform_2, window_bounds = array<i64: 1, 32>}, {pipeline_mode = #tpu.pipeline_mode<synchronous>, transform_indices = @transform_3, window_bounds = array<i64: 32, 32>}, {pipeline_mode = #tpu.pipeline_mode<synchronous>, transform_indices = @transform_4, window_bounds = array<i64: 1, 32>}, {transform_indices = @transform_5, window_bounds = array<i64: 8, 32>}]} {
    %c0_i32 = arith.constant 0 : i32
    %0 = arith.cmpi eq, %arg1, %c0_i32 : i32
    %1 = arith.extui %0 : i1 to i32
    %c0_i32_0 = arith.constant 0 : i32
    %2 = arith.cmpi ne, %1, %c0_i32_0 : i32
    scf.if %2 {
      %c0_10 = arith.constant 0 : index
      %c0_11 = arith.constant 0 : index
      %12 = vector.load %arg2[%c0_10, %c0_11] : memref<8x32xf32, #tpu.memory_space<vmem>>, vector<8x32xf32>
      %cst_12 = arith.constant dense<0.000000e+00> : vector<8xf32>
      %13 = vector.multi_reduction <add>, %12, %cst_12 [1] : vector<8x32xf32> to vector<8xf32>
      %14 = vector.shape_cast %13 : vector<8xf32> to vector<8x1xf32>
      %cst_13 = arith.constant 3.200000e+01 : f32
      %15 = vector.broadcast %cst_13 : f32 to vector<8x1xf32>
      %16 = arith.divf %14, %15 : vector<8x1xf32>
      %17 = vector.broadcast %16 : vector<8x1xf32> to vector<8x32xf32>
      %18 = arith.subf %12, %17 : vector<8x32xf32>
      %19 = arith.mulf %18, %18 : vector<8x32xf32>
      %cst_14 = arith.constant dense<0.000000e+00> : vector<8xf32>
      %20 = vector.multi_reduction <add>, %19, %cst_14 [1] : vector<8x32xf32> to vector<8xf32>
      %21 = vector.shape_cast %20 : vector<8xf32> to vector<8x1xf32>
      %cst_15 = arith.constant 3.100000e+01 : f32
      %22 = vector.broadcast %cst_15 : f32 to vector<8x1xf32>
      %23 = arith.divf %21, %22 : vector<8x1xf32>
      %24 = math.sqrt %23 : vector<8x1xf32>
      %cst_16 = arith.constant 9.99999997E-7 : f32
      %25 = vector.broadcast %cst_16 : f32 to vector<8x1xf32>
      %26 = arith.addf %24, %25 : vector<8x1xf32>
      %27 = tpu.reciprocal %26 : vector<8x1xf32> -> vector<8x1xf32>
      %c0_17 = arith.constant 0 : index
      %c0_18 = arith.constant 0 : index
      %28 = vector.load %arg3[%c0_17, %c0_18] : memref<1x32xf32, #tpu.memory_space<vmem>>, vector<1x32xf32>
      %29 = vector.broadcast %27 : vector<8x1xf32> to vector<8x32xf32>
      %30 = arith.mulf %18, %29 : vector<8x32xf32>
      %31 = vector.broadcast %28 : vector<1x32xf32> to vector<8x32xf32>
      %32 = arith.mulf %31, %30 : vector<8x32xf32>
      %c0_19 = arith.constant 0 : index
      %c0_20 = arith.constant 0 : index
      %33 = vector.load %arg4[%c0_19, %c0_20] : memref<1x32xf32, #tpu.memory_space<vmem>>, vector<1x32xf32>
      %34 = vector.broadcast %33 : vector<1x32xf32> to vector<8x32xf32>
      %35 = arith.addf %32, %34 : vector<8x32xf32>
      %c0_21 = arith.constant 0 : index
      %c0_22 = arith.constant 0 : index
      %36 = vector.load %arg8[%c0_21, %c0_22] : memref<8x32xf32, #tpu.memory_space<vmem>>, vector<8x32xf32>
      tpu.vector_store %arg8[%c0_21, %c0_22], %35 {strides = array<i32>} : memref<8x32xf32, #tpu.memory_space<vmem>>, vector<8x32xf32>,
    } else {
    }
    %c0 = arith.constant 0 : index
    %c0_1 = arith.constant 0 : index
    %3 = vector.load %arg8[%c0, %c0_1] : memref<8x32xf32, #tpu.memory_space<vmem>>, vector<8x32xf32>
    %c0_2 = arith.constant 0 : index
    %c0_3 = arith.constant 0 : index
    %4 = vector.load %arg5[%c0_2, %c0_3] : memref<32x32xf32, #tpu.memory_space<vmem>>, vector<32x32xf32>
    %cst = arith.constant dense<0.000000e+00> : vector<8x32xf32>
    %5 = tpu.matmul %3, %4, %cst {dimension_numbers = #tpu.dot_dimension_numbers<[1], [0], [0], [1], [0, 0, 1, 1], [], []>} : vector<8x32xf32>, vector<32x32xf32>, vector<8x32xf32> -> vector<8x32xf32>
    %c0_4 = arith.constant 0 : index
    %c0_5 = arith.constant 0 : index
    %6 = vector.load %arg6[%c0_4, %c0_5] : memref<1x32xf32, #tpu.memory_space<vmem>>, vector<1x32xf32>
    %7 = vector.broadcast %6 : vector<1x32xf32> to vector<8x32xf32>
    %8 = arith.addf %5, %7 : vector<8x32xf32>
    %c0_6 = arith.constant 0 : index
    %c0_7 = arith.constant 0 : index
    %9 = vector.load %arg2[%c0_6, %c0_7] : memref<8x32xf32, #tpu.memory_space<vmem>>, vector<8x32xf32>
    %10 = arith.addf %9, %8 : vector<8x32xf32>
    %c0_8 = arith.constant 0 : index
    %c0_9 = arith.constant 0 : index
    %11 = vector.load %arg7[%c0_8, %c0_9] : memref<8x32xf32, #tpu.memory_space<vmem>>, vector<8x32xf32>
    tpu.vector_store %arg7[%c0_8, %c0_9], %10 {strides = array<i32>} : memref<8x32xf32, #tpu.memory_space<vmem>>, vector<8x32xf32>,
    return
  }
  func.func @transform_0(%arg0: i32, %arg1: i32) -> (i32, i32) {
    %c0_i32 = arith.constant 0 : i32
    %c0_i32_0 = arith.constant 0 : i32
    return %arg0, %c0_i32 : i32, i32
  }
  func.func @transform_1(%arg0: i32, %arg1: i32) -> (i32, i32) {
    %c0_i32 = arith.constant 0 : i32
    %c0_i32_0 = arith.constant 0 : i32
    %c0_i32_1 = arith.constant 0 : i32
    return %c0_i32, %c0_i32_0 : i32, i32
  }
  func.func @transform_2(%arg0: i32, %arg1: i32) -> (i32, i32) {
    %c0_i32 = arith.constant 0 : i32
    %c0_i32_0 = arith.constant 0 : i32
    %c0_i32_1 = arith.constant 0 : i32
    return %c0_i32, %c0_i32_0 : i32, i32
  }
  func.func @transform_3(%arg0: i32, %arg1: i32) -> (i32, i32) {
    %c0_i32 = arith.constant 0 : i32
    %c0_i32_0 = arith.constant 0 : i32
    return %c0_i32, %arg1 : i32, i32
  }
  func.func @transform_4(%arg0: i32, %arg1: i32) -> (i32, i32) {
    %c0_i32 = arith.constant 0 : i32
    %c0_i32_0 = arith.constant 0 : i32
    return %c0_i32, %arg1 : i32, i32
  }
  func.func @transform_5(%arg0: i32, %arg1: i32) -> (i32, i32) {
    %c0_i32 = arith.constant 0 : i32
    return %arg0, %arg1 : i32, i32
  }
}

</mosaic_0001>

<bundles_post_ra>
// kernel: tpu_custom_call.1
= control target key start
LH: loop header
LB: loop body
LE: loop exit
PB: predicated region body
PF: predicated region fallthrough
CT: control target
= control target key end

     0   :  { %10 = vsyncpa [#allocation4], 0  ;;  %s1082_s0 = inlined_call_operand.hbm [shape: f32[16,32], index: 0, kind: input, shape index: {}]   ;;  %s1083_s1 = inlined_call_operand.vmem [shape: f32[1,32], index: 1, kind: input, shape index: {}]   ;;  %s1084_s2 = inlined_call_operand.vmem [shape: f32[1,32], index: 2, kind: input, shape index: {}]   ;;  %s1085_s3 = inlined_call_operand.hbm [shape: f32[32,32], index: 3, kind: input, shape index: {}]   ;;  %s1086_s4 = inlined_call_operand.vmem [shape: f32[1,32], index: 4, kind: input, shape index: {}]   ;;  %s1087_s5 = inlined_call_operand.hbm [shape: f32[16,32], index: 5, kind: output, shape index: {}]  }
   0x1   :  { %12 = vsyncpa [#allocation4 + $0x1], 0 }
   0x2   :  { %13 = vsyncpa [#allocation7], 0 }
   0x3   :  { %14 = vsyncpa [#allocation5], 0 }
   0x4   :  { %16 = vsyncpa [#allocation5 + $0x1], 0  ;;  %s850_s18 = smov 0   ;;  %s852_s19 = smov 0  }
   0x5   :  { %s854_s20 = smov 0   ;;  %s856_s21 = smov 0  }
   0x6   :  { %s858_s22 = smov 0   ;;  %s860_s23 = smov 0  }
   0x7 LB: > { %s542_s24 = sadd.s32 4294967295, %s810_s23   ;;  %s543_s25 = sadd.s32 4294967294, %s810_s23   ;;  %s810_s23 = sphi %s860_s23, %s22_s23   ;;  %s806_s22 = sphi %s858_s22, %s1111_s22   ;;  %s802_s21 = sphi %s856_s21, %s1110_s21   ;;  %s798_s20 = sphi %s854_s20, %s1109_s20   ;;  %s794_s19 = sphi %s852_s19, %s1108_s19   ;;  %s790_s18 = sphi %s850_s18, %s1107_s18  }
   0x8   : > { %p54_p0 = scmp.ne.s32.totalorder %s794_s19, %s790_s18  ;;  %p884_p1 = scmp.eq.s32.totalorder %s542_s24, 0 }
   0x9   : > { %p888_p2 = scmp.eq.s32.totalorder %s542_s24, 1  ;;  %p180_p3 = scmp.eq.s32.totalorder %s543_s25, 1 }
   0xa   : > { %s1092_s26 = scalar_select %p884_p1, 1, 0 }
   0xb   : > { %s1093_s27 = scalar_select %p888_p2, 1, 0 }
   0xc   : > { %p894_p4 = por %p884_p1, %p54_p0  ;;  %p544_p5 = scmp.ge.s32.totalorder %s810_s23, 1 }
   0xd   : > { %p899_p6 = por %p180_p3, %p54_p0  ;;  %p187_p7 = scmp.lt.s32.totalorder %s810_s23, 3 }
   0xe   : > { %s1094_s28 = scalar_select %p894_p4, 1, 0 }
   0xf   : > { %s1095_s29 = scalar_select %p899_p6, 1, 0 }
  0x10   : > { %p904_p8 = pnand %p544_p5, %p187_p7  ;;  %s812_s6 = smov [#allocation6]  }
  0x11   : > { %s207_s7 = sshll.u32 %s812_s6, 4  ;;  %s34_s9 = sadd.s32 1, %s806_s22  ;;  %s208_s7 = int_to_ptr.vmem [resolvable:$true] %s207_s7 }
  0x12   : > { %s1096_s30 = scalar_select %p904_p8, 1, 0 }
  0x13   : > { %p592_p9 = pneg %p904_p8  ;;  %s666_s12 = scalar_lea.hbm %s1085_s3, 512 }
  0x14   : > { %p667_p12 = scmp.ne.s32.totalorder %s1085_s3, %s666_s12  ;;  %p673_p5 = scmp.lt.u32.totalorder %s666_s12, %s1085_s3 }
  0x15   : > { %p913_p11 = pnand %p592_p9, %p884_p1 }
  0x17   : > { %p668_p13 = pneg %p913_p11 }
  0x19   : > { %p669_p0 = pnand %p668_p13, %p667_p12 }
  0x1b   : > { %p670_p3 = pneg %p669_p0 }
  0x1d   : > { %p675_p7 = pnand %p673_p5, %p670_p3 }
  0x1f   : > { %678 = shalt.err (!%p675_p7)
}
  0x20   : > { %s679_s17 = scalar_lea.vmem %s208_s7, 512  ;;  %p687_p1 = scmp.lt.s32.totalorder %s208_s7, %s208_s7 }
  0x21   : > { %p680_p9 = scmp.ne.s32.totalorder %s208_s7, %s679_s17  ;;  %p688_p4 = scmp.lt.s32.totalorder %s679_s17, %s679_s17 }
  0x23   : > { %p682_p10 = pnand %p680_p9, %p668_p13  ;;  %p689_p8 = por %p688_p4, %p687_p1 }
  0x25   : > { %p683_p6 = pneg %p682_p10 }
  0x27   : > { %p690_p2 = pnand %p689_p8, %p683_p6 }
  0x29   : > { %693 = shalt.err (!%p690_p2)
}
  0x2a   : > { %s813_s24 = smov 128   ;;  %s814_s25 = smov 8  }
  0x2b   : > { %595 = dma.hbm_to_vmem [thread:$0]  (!%p913_p11), %s1085_s3, 512, %s208_s7, [#allocation7], %s813_s24, %s813_s24, %s814_s25  }
  0x2c   : > { %p36_p1 = scmp.ge.s32.totalorder %s34_s9, 2  ;;  %s41_s11 = sadd.s32 1, %s798_s20 }
  0x2d   : > { %p48_p2 = scmp.ne.s32.totalorder %s798_s20, %s794_s19  ;;  %p49_p4 = scmp.eq.s32.totalorder %s810_s23, 0 }
  0x2e   : > { %s1113_s9 = smov (%p36_p1, %s34_s9), 0  ;;  %p1099_p8 = scmp.ne.s32.totalorder %s1093_s27, 0 }
  0x2f   : > { %p940_p6 = por %p49_p4, %p48_p2  ;;  %s38_s8 = ssub.s32 %s806_s22, %s1113_s9 }
  0x30   : > { %p946_p10 = por %p1099_p8, %p48_p2  ;;  %p605_p12 = scmp.lt.s32.totalorder %s810_s23, 2 }
  0x31   : > { %p39_p11 = scmp.eq.s32.totalorder %s38_s8, 0  ;;  %s227_s7 = sand.u32 1, %s798_s20  }
  0x32   : > { %s548_s14 = sshll.u32 %s227_s7, 3  ;;  %s549_s16 = sshll.u32 %s806_s22, 7 }
  0x33   : > { %s955_s15 = scalar_select %p39_p11, %s798_s20, %s41_s11  }
  0x34   : > { %s961_s25 = scalar_lea.hbm %s1082_s0, %s549_s16  ;;  %s231_s27 = scalar_lea.vmem [#allocation3], %s548_s14 }
  0x35   : > { %s238_s6 = sshll.u32 %s231_s27, 4  ;;  %p967_p13 = pnand %p605_p12, %p940_p6  ;;  %s963_s6 = int_to_ptr.vmem [resolvable:$true] %s238_s6 }
  0x36   : > { %s228_s11 = scalar_lea.sflag [#allocation4], %s227_s7  ;;  %s694_s8 = scalar_lea.hbm %s961_s25, 128 }
  0x37   : > { %p695_p0 = scmp.ne.s32.totalorder %s961_s25, %s694_s8  ;;  %p696_p3 = pneg %p967_p13 }
  0x38   : > { %s699_s17 = scalar_lea.hbm %s1082_s0, 256  ;;  %p700_p9 = scmp.lt.u32.totalorder %s961_s25, %s1082_s0 }
  0x39   : > { %p697_p5 = pnand %p696_p3, %p695_p0  ;;  %p701_p1 = scmp.lt.u32.totalorder %s699_s17, %s694_s8 }
  0x3a   : > { %p703_p4 = scmp.lt.u32.totalorder %s694_s8, %s961_s25 }
  0x3b   : > { %p698_p7 = pneg %p697_p5  ;;  %p702_p2 = por %p701_p1, %p700_p9 }
  0x3d   : > { %p704_p6 = por %p703_p4, %p702_p2 }
  0x3f   : > { %p705_p8 = pnand %p704_p6, %p698_p7 }
  0x41   : > { %708 = shalt.err (!%p705_p8)
}
  0x42   : > { %s709_s7 = scalar_lea.vmem %s963_s6, 128  ;;  %s815_s27 = smov [#allocation3]  }
  0x43   : > { %p710_p12 = scmp.ne.s32.totalorder %s963_s6, %s709_s7  ;;  %s714_s14 = sshll.u32 %s815_s27, 4  ;;  %s715_s14 = int_to_ptr.vmem [resolvable:$false] %s714_s14 }
  0x44   : > { %s716_s16 = scalar_lea.vmem %s715_s14, 256  ;;  %p717_p5 = scmp.lt.s32.totalorder %s963_s6, %s715_s14 }
  0x45   : > { %p712_p11 = pnand %p710_p12, %p696_p3  ;;  %p718_p9 = scmp.lt.s32.totalorder %s716_s16, %s709_s7 }
  0x47   : > { %p713_p0 = pneg %p712_p11  ;;  %p719_p1 = por %p718_p9, %p717_p5 }
  0x49   : > { %p720_p2 = pnand %p719_p1, %p713_p0 }
  0x4b   : > { %723 = shalt.err (!%p720_p2)
}
  0x4c   : > { %599 = dma.hbm_to_vmem [thread:$0]  (!%p967_p13), %s961_s25, 128, %s963_s6, %s228_s11  }
  0x4d   : > { %p1102_p7 = scmp.ne.s32.totalorder %s1096_s30, 0 }
  0x4e   : > { %s999_s8 = sand.u32 (!%p1102_p7), 1, %s794_s19   ;;  %p1103_p3 = scmp.ne.s32.totalorder (!%p1102_p7), %s1094_s28, 0 }
  0x4f   : > { %247 = sbr.rel (%p1102_p7) target bundleno = 657 (0x291), region = 40  ;;  %s551_s17 = sshll.u32 (!%p1102_p7), %s999_s8, 3 }
  0x50   : > { %s250_s12 = scalar_lea.sflag (!%p1102_p7), [#allocation4], %s999_s8  ;;  %s253_s24 = scalar_lea.vmem (!%p1102_p7), [#allocation3], %s551_s17 }
  0x56   : > { %777 = dma.done.wait (%p1103_p3), %s250_s12, 128  }
  0x57   : > { %779 = vsyncadd (%p1103_p3), %s250_s12, 4294967168  ;;  %p1104_p13 = scmp.ne.s32.totalorder %s1092_s26, 0 }
  0x59   : > { %781 = dma.done.wait (%p1104_p13), [#allocation7], 512  }
  0x5a   : > { %783 = vsyncadd (%p1104_p13), [#allocation7], 4294966784  ;;  %vm295_vm0 = vcmask 261120   ;;  %v294_v0 = vld [vmem:[%s253_s24] sm:$0xff]  ;;  %v336_v7 = vld [vmem:[#allocation6] sm:$0xff]  ;;  %v816_v10 = vmov 0.0|0.0  }
  0x5b   : > { %v296_v1 = vsel %vm295_vm0, %v294_v0, 0.0  ;;  %v337_v8 = vld [vmem:[#allocation6 + $0x8] sm:$0xff]  ;;  %578 = vmatprep.subr.bf16.mxu0 %v816_v10  ;;  %v338_v11 = vld [vmem:[#allocation6 + $0x10] sm:$0xff]  ;;  %v339_v12 = vld [vmem:[#allocation6 + $0x18] sm:$0xff]  ;;  %vm817_vm1 = vmmov 0   ;;  %v818_v14 = vmov 0.0  }
  0x5c   : > { %297 = vadd.xlane.f32.xlu0 %v296_v1  ;;  %v579_v9 = vpack.c.bf16 %v337_v8, %v336_v7  ;;  %v582_v13 = vpack.c.bf16 %v339_v12, %v338_v11  ;;  %575 = vmatprep.mubr.msk.f32.mxu0 %vm817_vm1, %v818_v14  ;;  %v554_v24 = vld [vmem:[%s1083_s1] ss:$0 sm:$0xff]  ;;  %s559_s11 = sshll.u32 %s802_s21, 7  ;;  %s286_s7 = scalar_lea.vmem [#allocation8], %s551_s17 }
  0x5d   : > { %v555_v26 = vld [vmem:[%s1084_s2] ss:$0 sm:$0xff]  ;;  %s439_s27 = sshll.u32 %s286_s7, 4  ;;  %s1032_s12 = scalar_lea.hbm %s1087_s5, %s559_s11  ;;  %s1034_s27 = int_to_ptr.vmem [resolvable:$true] %s439_s27 }
  0x5e   : > { %580 = vmatpush3.bf16.msra.mxu0 %v579_v9  ;;  %v556_v30 = vld [vmem:[%s1086_s4] ss:$0 sm:$0xff]  ;;  %s425_s24 = scalar_lea.sflag [#allocation5], %s999_s8  ;;  %s724_s21 = scalar_lea.vmem %s1034_s27, 128 }
  0x5f   : > { %581 = vmatprep.subr.bf16.mxu0 %v816_v10  ;;  %p725_p4 = scmp.ne.s32.totalorder %s1034_s27, %s724_s21  ;;  %s819_s17 = smov [#allocation8]  }
  0x60   : > { %s728_s26 = sshll.u32 %s819_s17, 4  ;;  %s729_s26 = int_to_ptr.vmem [resolvable:$false] %s728_s26 }
  0x61   : > { %p726_p6 = pnand %p725_p4, %p946_p10  ;;  %s730_s28 = scalar_lea.vmem %s729_s26, 256 }
  0x62   : > { %583 = vmatpush3.bf16.msra.mxu0 %v582_v13  ;;  %p731_p12 = scmp.lt.s32.totalorder %s1034_s27, %s729_s26  ;;  %p732_p11 = scmp.lt.s32.totalorder %s730_s28, %s724_s21 }
  0x63   : > { %p727_p8 = pneg %p726_p6 }
  0x64   : > { %p733_p0 = por %p732_p11, %p731_p12 }
  0x66   : > { %p734_p5 = pnand %p733_p0, %p727_p8 }
  0xe9   : > { %v298_v2 = vpop.xlane.xlu0 %297 }
  0xea   : > { %v300_v3 = vmul.f32 0.03125, %v298_v2 }
  0xec   : > { %v301_v4 = vsub.f32 %v294_v0, %v300_v3 }
  0xee   : > { %v302_v5 = vmul.f32 %v301_v4, %v301_v4 }
  0xf0   : > { %v303_v6 = vsel %vm295_vm0, %v302_v5, 0.0 }
  0xf1   : > { %304 = vadd.xlane.f32.xlu0 %v303_v6 }
 0x17e   : > { %v305_v15 = vpop.xlane.xlu0 %304 }
 0x17f   : > { %v307_v16 = vmul.f32 0.032258064, %v305_v15 }
 0x181   : > { %662 = vrsqrt.f32 %v307_v16  ;;  %vm310_vm2 = vcmp.eq.f32.partialorder %v307_v16, inf  ;;  %v313_v19 = vand.u32 2147483648, %v307_v16  ;;  %vm312_vm3 = vcmp.eq.f32.partialorder %v307_v16, 0.0 }
 0x18b   : > { %v663_v17 = vpop.eup %662 }
 0x18c   : > { %v309_v18 = vmul.f32 %v663_v17, %v307_v16 }
 0x18e   : > { %v311_v20 = vsel %vm310_vm2, %v307_v16, %v309_v18 }
 0x18f   : > { %v314_v21 = vsel %vm312_vm3, %v313_v19, %v311_v20 }
 0x190   : > { %v315_v22 = vadd.f32 1e-06, %v314_v21 }
 0x192   : > { %664 = vrcp.f32 %v315_v22 }
 0x19c   : > { %v665_v23 = vpop.eup %664 }
 0x19d   : > { %v318_v25 = vmul.f32 %v665_v23, %v301_v4 }
 0x19f   : > { %v325_v27 = vmul.f32 %v554_v24, %v318_v25 }
 0x1a1   : > { %v333_v28 = vadd.f32 %v555_v26, %v325_v27 }
 0x1a3   : > { %334 = vst.msk [vmem:[#allocation2] sm:$0xff] %vm295_vm0, %v333_v28 }
 0x1aa   : > { %v335_v29 = vld [vmem:[#allocation2] sm:$0xff] }
 0x1ab   : > { %576 = vmatmul.mubr.msk.f32.vlgmr.msra.gmra.mrb[0].mxu0 %vm295_vm0, %v335_v29 }
 0x27e   : > { %v417_v31 = vpop.f32.mrb[0].mxu0 }
 0x27f   : > { %v418_v32 = vadd.f32 %v556_v30, %v417_v31  ;;  %v577_v33 = vpop.f32.mrb[1].mxu0 }
 0x281   : > { %v422_v34 = vadd.f32 %v418_v32, %v294_v0 }
 0x283   : > { %423 = vst.msk [vmem:[%s286_s7] sm:$0xff] %vm295_vm0, %v422_v34 }
 0x284   : > { %737 = shalt.err (!%p734_p5)
}
 0x285   : > { %s738_s8 = scalar_lea.hbm %s1032_s12, 128  ;;  %s742_s6 = scalar_lea.hbm %s1087_s5, 256 }
 0x286   : > { %p739_p9 = scmp.ne.s32.totalorder %s1032_s12, %s738_s8  ;;  %p743_p7 = scmp.lt.u32.totalorder %s1032_s12, %s1087_s5 }
 0x287   : > { %p744_p3 = scmp.lt.u32.totalorder %s742_s6, %s738_s8  ;;  %p746_p4 = scmp.lt.u32.totalorder %s738_s8, %s1032_s12 }
 0x288   : > { %p740_p1 = pnand %p739_p9, %p946_p10 }
 0x289   : > { %p745_p13 = por %p744_p3, %p743_p7 }
 0x28a   : > { %p741_p2 = pneg %p740_p1 }
 0x28b   : > { %p747_p6 = por %p746_p4, %p745_p13 }
 0x28d   : > { %p748_p8 = pnand %p747_p6, %p741_p2 }
 0x28f   : > { %751 = shalt.err (!%p748_p8)
}
 0x290   : > { %590 = dma.vmem_to_hbm [thread:$0]  (%p946_p10), %s1034_s27, 128, %s1032_s12, %s425_s24  }
 0x291 PF: > { %s451_s7 = sand.u32 1, %s790_s18   ;;  %p1105_p12 = scmp.ne.s32.totalorder %s1095_s29, 0 }
 0x292   : > { %p1106_p11 = scmp.ge.s32.totalorder %s810_s23, 2  ;;  %s452_s14 = scalar_lea.sflag [#allocation5], %s451_s7 }
 0x294   : > { %p601_p0 = pnand %p1106_p11, %p1105_p12 }
 0x296   : > { %785 = dma.done.wait (!%p601_p0), %s452_s14, 128  }
 0x297   : > { %787 = vsyncadd (!%p601_p0), %s452_s14, 4294967168  ;;  %s22_s23 = sadd.s32 1, %s810_s23   ;;  %s1107_s18 = smov %s794_s19 }
 0x298   : > { %p19_p5 = scmp.ge.s32.totalorder %s22_s23, 4   ;;  %s1108_s19 = smov %s798_s20 }
 0x299   : > { %s1109_s20 = smov %s955_s15  ;;  %s1110_s21 = smov %s806_s22 }
 0x29a   : > { %s1111_s22 = smov %s1113_s9  ;;  %21 = sbr.rel (!%p19_p5) target bundleno = 7 (0x7), region = 97 }
 0x2a1   :  { %457 = vsyncpa [#allocation4], 1 }
 0x2a2   :  { %459 = vsyncpa [#allocation4 + $0x1], 1 }
 0x2a3   :  { %460 = vsyncpa [#allocation7], 1 }
 0x2a4   :  { %461 = vsyncpa [#allocation5], 1 }
 0x2a5   :  { %463 = vsyncpa [#allocation5 + $0x1], 1 }

</bundles_post_ra>
